<compile_context>
chip_gen: v6e
topology: v6e:2x2x1
jax: 0.10.0
libtpu: 0.0.40
codegen_flags: <defaults>
</compile_context>

<pallas_src>
import functools

import jax
import jax.numpy as jnp
from jax.experimental import pallas as pl
from jax.experimental.pallas import tpu as pltpu


def _bert_pooler_kernel(x_ref, w_ref, b_ref, o_ref, acc_ref, *, inv_seq_len):
    # x_ref: [TB, TS, H]   streamed sequence tile
    # w_ref: [H, H]        dense weight, pre-transposed (resident)
    # b_ref: [1, H]        bias, already f32 (resident)
    # o_ref: [TB, H]       output block (constant across the S grid axis)
    # acc_ref: [TB, H] f32 running sum over the sequence axis
    s_idx = pl.program_id(1)

    @pl.when(s_idx == 0)
    def _init():
        acc_ref[...] = jnp.zeros_like(acc_ref)

    # Partial sum of this sequence tile; widen inside the reduce (no full
    # f32 copy of the tile).
    acc_ref[...] += jnp.sum(x_ref[...], axis=1, dtype=jnp.float32)

    @pl.when(s_idx == pl.num_programs(1) - 1)
    def _epilogue():
        # Mean over the full (true) sequence length.
        avg = (acc_ref[...] * inv_seq_len).astype(w_ref.dtype)   # native-width MXU operands
        y = jnp.dot(avg, w_ref[...], preferred_element_type=jnp.float32)
        y = y + b_ref[...]                                       # bias already f32
        o_ref[...] = jnp.tanh(y).astype(o_ref.dtype)


def _choose_tiles(B, S, H, itemsize, input_stream_budget=16 * 1024 * 1024):
    """Pick (TB, TS) so double-buffered input tiles fit comfortably in VMEM
    and all BlockSpec divisibility constraints hold (TS divides S, so no
    padded-row masking is needed)."""
    # Batch tile: keep sublane-aligned multiples of 8 when possible.
    TB = B
    if B % 8 == 0:
        for tb in (64, 32, 16, 8):
            if B % tb == 0:
                TB = tb
                break
    # Sequence tile: largest multiple of 8 that divides S and keeps the
    # double-buffered stream under budget; tiny / odd S falls back to S.
    TS = S
    if S % 8 == 0:
        max_ts = max(8, input_stream_budget // (2 * TB * H * itemsize))
        best = None
        d = 8
        while d <= S:
            if S % d == 0 and d <= max_ts:
                best = d
            d += 8
        if best is not None:
            TS = best
    return TB, TS


def bert_pooler(hidden_states, weight, bias):
    """hidden_states: [B, S, H]; weight: [H_out, H_in] (PyTorch convention); bias: [H]."""
    B, S, H = hidden_states.shape
    TB, TS = _choose_tiles(B, S, H, hidden_states.dtype.itemsize)

    w_t = weight.T                                   # [H_in, H_out]: kernel does avg @ w_t
    b2 = bias.reshape(1, H).astype(jnp.float32)      # widen once, outside the hot loop

    kernel = functools.partial(_bert_pooler_kernel, inv_seq_len=1.0 / S)

    # TODO(synk): for degenerate toy shapes (B=2, H=32) the [B, H] output is not
    # lane-dense; real BERT sizes (H >= 768) already satisfy the (8, 128) layout.
    return pl.pallas_call(
        kernel,
        out_shape=jax.ShapeDtypeStruct((B, H), hidden_states.dtype),
        grid_spec=pltpu.PrefetchScalarGridSpec(
            num_scalar_prefetch=0,
            grid=(B // TB, S // TS),                                  # reduction axis last
            in_specs=[
                pl.BlockSpec((TB, TS, H), lambda b, s: (b, s, 0)),    # streamed input
                pl.BlockSpec((H, H), lambda b, s: (0, 0)),            # weight: resident
                pl.BlockSpec((1, H), lambda b, s: (0, 0)),            # bias: resident
            ],
            out_specs=pl.BlockSpec((TB, H), lambda b, s: (b, 0)),     # constant over s
            scratch_shapes=[pltpu.VMEM((TB, H), jnp.float32)],        # f32 accumulator
        ),
        compiler_params=pltpu.CompilerParams(
            dimension_semantics=("parallel", "arbitrary"),            # batch || , seq = reduce
            vmem_limit_bytes=32 * 1024 * 1024,
        ),
    )(hidden_states, w_t, b2)


def bert_pooler_ref(hidden_states, weight, bias):
    avg = jnp.mean(hidden_states.astype(jnp.float32), axis=1)
    y = avg @ weight.T.astype(jnp.float32) + bias.astype(jnp.float32)
    return jnp.tanh(y).astype(hidden_states.dtype)


if __name__ == "__main__":
    B, S, H = 2, 8, 32          # batch=2, seq=8, hidden=32
    key = jax.random.PRNGKey(0)
    k_x, k_w, k_b = jax.random.split(key, 3)

    hidden_states = jax.random.normal(k_x, (B, S, H), dtype=jnp.float32)
    # Deterministic "Linear(H, H)" params (PyTorch shape: weight [H_out, H_in], bias [H]).
    weight = jax.random.normal(k_w, (H, H), dtype=jnp.float32) * 0.02
    bias = jax.random.normal(k_b, (H,), dtype=jnp.float32) * 0.02

    out = bert_pooler(hidden_states, weight, bias)
    out = jax.block_until_ready(out)

    ref = bert_pooler_ref(hidden_states, weight, bias)
    assert out.shape == (B, H), out.shape
    assert jnp.allclose(out, ref, atol=1e-5, rtol=1e-5), float(jnp.max(jnp.abs(out - ref)))

    print("KERNEL_OK")
</pallas_src>

<mosaic_0001>
module attributes {stable_mosaic.version = 11 : i64} {
  func.func @_bert_pooler_kernel(%arg0: i32, %arg1: i32, %arg2: memref<2x8x32xf32, #tpu.memory_space<vmem>>, %arg3: memref<32x32xf32, #tpu.memory_space<vmem>>, %arg4: memref<1x32xf32, #tpu.memory_space<vmem>>, %arg5: memref<2x32xf32, #tpu.memory_space<vmem>>, %arg6: memref<2x32xf32, #tpu.memory_space<vmem>>) attributes {dimension_semantics = [#tpu.dimension_semantics<parallel>, #tpu.dimension_semantics<arbitrary>], iteration_bounds = array<i64: 1, 1>, scalar_prefetch = 0 : i64, scratch_operands = 1 : i64, tpu.core_type = #tpu.core_type<tc>, window_params = [{transform_indices = @transform_0, window_bounds = array<i64: 2, 8, 32>}, {pipeline_mode = #tpu.pipeline_mode<synchronous>, transform_indices = @transform_1, window_bounds = array<i64: 32, 32>}, {pipeline_mode = #tpu.pipeline_mode<synchronous>, transform_indices = @transform_2, window_bounds = array<i64: 1, 32>}, {transform_indices = @transform_3, window_bounds = array<i64: 2, 32>}]} {
    %c0_i32 = arith.constant 0 : i32
    %0 = arith.cmpi eq, %arg1, %c0_i32 : i32
    %1 = arith.extui %0 : i1 to i32
    %c0_i32_0 = arith.constant 0 : i32
    %2 = arith.cmpi ne, %1, %c0_i32_0 : i32
    scf.if %2 {
      %cst_9 = arith.constant 0.000000e+00 : f32
      %11 = vector.broadcast %cst_9 : f32 to vector<2x32xf32>
      %c0_10 = arith.constant 0 : index
      %c0_11 = arith.constant 0 : index
      %12 = vector.load %arg6[%c0_10, %c0_11] : memref<2x32xf32, #tpu.memory_space<vmem>>, vector<2x32xf32>
      tpu.vector_store %arg6[%c0_10, %c0_11], %11 {strides = array<i32>} : memref<2x32xf32, #tpu.memory_space<vmem>>, vector<2x32xf32>,
    } else {
    }
    %c0 = arith.constant 0 : index
    %c0_1 = arith.constant 0 : index
    %3 = vector.load %arg6[%c0, %c0_1] : memref<2x32xf32, #tpu.memory_space<vmem>>, vector<2x32xf32>
    %c0_2 = arith.constant 0 : index
    %c0_3 = arith.constant 0 : index
    %c0_4 = arith.constant 0 : index
    %4 = vector.load %arg2[%c0_2, %c0_3, %c0_4] : memref<2x8x32xf32, #tpu.memory_space<vmem>>, vector<2x8x32xf32>
    %cst = arith.constant dense<0.000000e+00> : vector<2x32xf32>
    %5 = vector.multi_reduction <add>, %4, %cst [1] : vector<2x8x32xf32> to vector<2x32xf32>
    %6 = arith.addf %3, %5 : vector<2x32xf32>
    %c0_5 = arith.constant 0 : index
    %c0_6 = arith.constant 0 : index
    %7 = vector.load %arg6[%c0_5, %c0_6] : memref<2x32xf32, #tpu.memory_space<vmem>>, vector<2x32xf32>
    tpu.vector_store %arg6[%c0_5, %c0_6], %6 {strides = array<i32>} : memref<2x32xf32, #tpu.memory_space<vmem>>, vector<2x32xf32>,
    %c0_i32_7 = arith.constant 0 : i32
    %8 = arith.cmpi eq, %arg1, %c0_i32_7 : i32
    %9 = arith.extui %8 : i1 to i32
    %c0_i32_8 = arith.constant 0 : i32
    %10 = arith.cmpi ne, %9, %c0_i32_8 : i32
    scf.if %10 {
      %c0_9 = arith.constant 0 : index
      %c0_10 = arith.constant 0 : index
      %11 = vector.load %arg6[%c0_9, %c0_10] : memref<2x32xf32, #tpu.memory_space<vmem>>, vector<2x32xf32>
      %cst_11 = arith.constant 1.250000e-01 : f32
      %12 = vector.broadcast %cst_11 : f32 to vector<2x32xf32>
      %13 = arith.mulf %11, %12 : vector<2x32xf32>
      %c0_12 = arith.constant 0 : index
      %c0_13 = arith.constant 0 : index
      %14 = vector.load %arg3[%c0_12, %c0_13] : memref<32x32xf32, #tpu.memory_space<vmem>>, vector<32x32xf32>
      %cst_14 = arith.constant dense<0.000000e+00> : vector<2x32xf32>
      %15 = tpu.matmul %13, %14, %cst_14 {dimension_numbers = #tpu.dot_dimension_numbers<[1], [0], [0], [1], [0, 0, 1, 1], [], []>} : vector<2x32xf32>, vector<32x32xf32>, vector<2x32xf32> -> vector<2x32xf32>
      %c0_15 = arith.constant 0 : index
      %c0_16 = arith.constant 0 : index
      %16 = vector.load %arg4[%c0_15, %c0_16] : memref<1x32xf32, #tpu.memory_space<vmem>>, vector<1x32xf32>
      %17 = vector.broadcast %16 : vector<1x32xf32> to vector<2x32xf32>
      %18 = arith.addf %15, %17 : vector<2x32xf32>
      %19 = math.tanh %18 : vector<2x32xf32>
      %c0_17 = arith.constant 0 : index
      %c0_18 = arith.constant 0 : index
      %20 = vector.load %arg5[%c0_17, %c0_18] : memref<2x32xf32, #tpu.memory_space<vmem>>, vector<2x32xf32>
      tpu.vector_store %arg5[%c0_17, %c0_18], %19 {strides = array<i32>} : memref<2x32xf32, #tpu.memory_space<vmem>>, vector<2x32xf32>,
    } else {
    }
    return
  }
  func.func @transform_0(%arg0: i32, %arg1: i32) -> (i32, i32, i32) {
    %c0_i32 = arith.constant 0 : i32
    %c0_i32_0 = arith.constant 0 : i32
    return %arg0, %arg1, %c0_i32 : i32, i32, i32
  }
  func.func @transform_1(%arg0: i32, %arg1: i32) -> (i32, i32) {
    %c0_i32 = arith.constant 0 : i32
    %c0_i32_0 = arith.constant 0 : i32
    %c0_i32_1 = arith.constant 0 : i32
    return %c0_i32, %c0_i32_0 : i32, i32
  }
  func.func @transform_2(%arg0: i32, %arg1: i32) -> (i32, i32) {
    %c0_i32 = arith.constant 0 : i32
    %c0_i32_0 = arith.constant 0 : i32
    %c0_i32_1 = arith.constant 0 : i32
    return %c0_i32, %c0_i32_0 : i32, i32
  }
  func.func @transform_3(%arg0: i32, %arg1: i32) -> (i32, i32) {
    %c0_i32 = arith.constant 0 : i32
    %c0_i32_0 = arith.constant 0 : i32
    return %arg0, %c0_i32 : i32, i32
  }
}

</mosaic_0001>

<bundles_post_ra>
// kernel: tpu_custom_call.1
= control target key start
LH: loop header
LB: loop body
LE: loop exit
PB: predicated region body
PF: predicated region fallthrough
CT: control target
= control target key end

     0   :  { %8 = vsyncpa [#allocation4], 0  ;;  %s320_s0 = inlined_call_operand.hbm [shape: f32[2,8,32], index: 0, kind: input, shape index: {}]   ;;  %s321_s1 = inlined_call_operand.hbm [shape: f32[32,32], index: 1, kind: input, shape index: {}]   ;;  %s322_s2 = inlined_call_operand.vmem [shape: f32[1,32], index: 2, kind: input, shape index: {}]   ;;  %s323_s3 = inlined_call_operand.hbm [shape: f32[2,32], index: 3, kind: output, shape index: {}]  }
   0x1   :  { %9 = vsyncpa [#allocation7], 0 }
   0x2   :  { %10 = vsyncpa [#allocation5], 0  ;;  %s275_s12 = smov [#allocation3]  }
   0x3   :  { %s16_s13 = sshll.u32 %s275_s12, 4  ;;  %s17_s13 = int_to_ptr.vmem [resolvable:$true] %s16_s13 }
   0x4   :  { %s217_s14 = scalar_lea.vmem %s17_s13, 256  ;;  %p222_p1 = scmp.lt.s32.totalorder %s17_s13, %s17_s13 }
   0x5   :  { %p218_p0 = scmp.ne.s32.totalorder %s17_s13, %s217_s14  ;;  %p223_p2 = scmp.lt.s32.totalorder %s217_s14, %s217_s14 }
   0x7   :  { %p224_p3 = por %p223_p2, %p222_p1 }
   0x9   :  { %p225_p4 = pnand %p224_p3, %p218_p0 }
   0xb   :  { %228 = shalt.err (!%p225_p4)
}
   0xc   :  { %s276_s15 = smov 128   ;;  %s277_s16 = smov 8  }
   0xd   :  { %22 = dma.hbm_to_vmem [thread:$0]  %s320_s0, 256, %s17_s13, [#allocation4], %s276_s15, %s276_s15, %s277_s16  }
   0xe   :  { %s278_s19 = smov [#allocation6]  }
   0xf   :  { %s28_s20 = sshll.u32 %s278_s19, 4  ;;  %s29_s20 = int_to_ptr.vmem [resolvable:$true] %s28_s20 }
  0x10   :  { %s237_s21 = scalar_lea.vmem %s29_s20, 512  ;;  %p242_p6 = scmp.lt.s32.totalorder %s29_s20, %s29_s20 }
  0x11   :  { %p238_p5 = scmp.ne.s32.totalorder %s29_s20, %s237_s21  ;;  %p243_p7 = scmp.lt.s32.totalorder %s237_s21, %s237_s21 }
  0x13   :  { %p244_p8 = por %p243_p7, %p242_p6 }
  0x15   :  { %p245_p9 = pnand %p244_p8, %p238_p5 }
  0x17   :  { %248 = shalt.err (!%p245_p9)
}
  0x18   :  { %34 = dma.hbm_to_vmem [thread:$0]  %s321_s1, 512, %s29_s20, [#allocation7], %s276_s15, %s276_s15, %s277_s16  }
  0x19   :  { %269 = dma.done.wait [#allocation4], 256  }
  0x1a   :  { %270 = vsyncadd [#allocation4], 4294967040 }
  0x1b   :  { %271 = dma.done.wait [#allocation7], 512  }
  0x1c   :  { %272 = vsyncadd [#allocation7], 4294966784  ;;  %vm47_vm0 = vcmask 254976   ;;  %v279_v0 = vmov 0.0   ;;  %vm280_vm1 = vmmov 0   ;;  %vm52_vm2 = vcmask 261120  }
  0x1d   :  { %48 = vst.msk [vmem:[#allocation2] sm:$0x3] %vm47_vm0, %v279_v0  ;;  %189 = vmatprep.subr.mxu0 %v279_v0  ;;  %197 = vmatprep.mubr.msk.f32.mxu0 %vm280_vm1, %v279_v0  ;;  %v83_v1 = vld [vmem:[#allocation6 + $0x18] sm:$0xff]  ;;  %v82_v2 = vld [vmem:[#allocation6 + $0x10] sm:$0xff]  ;;  %v81_v4 = vld [vmem:[#allocation6 + $0x8] sm:$0xff]  ;;  %vm69_vm3 = vcmask 1041409  }
  0x1e   :  { %190 = vmatpush3.msra.mxu0 %v83_v1  ;;  %v50_v3 = vld [vmem:[#allocation3] sm:$0xff]  ;;  %v51_v5 = vld [vmem:[#allocation3 + $0x8] sm:$0xff]  ;;  %v80_v9 = vld [vmem:[#allocation6] sm:$0xff]  ;;  %s281_s24 = smov [#allocation8]  }
  0x1f   :  { %191 = vmatprep.subr.mxu0 %v279_v0  ;;  %v53_v6 = vsel %vm52_vm2, %v50_v3, 0.0  ;;  %v60_v8 = vsel %vm52_vm2, %v51_v5, 0.0  ;;  %v182_v26 = vld [vmem:[%s322_s2] ss:$0 sm:$0xff]  ;;  %s172_s25 = sshll.u32 %s281_s24, 4  ;;  %s173_s25 = int_to_ptr.vmem [resolvable:$true] %s172_s25 }
  0x20   :  { %192 = vmatpush3.msra.mxu0 %v82_v2  ;;  %v54_v7 = vrot.slane %v53_v6, 4  ;;  %v61_v10 = vrot.slane %v60_v8, 4  ;;  %s249_s26 = scalar_lea.vmem %s173_s25, 32  ;;  %p254_p11 = scmp.lt.s32.totalorder %s173_s25, %s173_s25 }
  0x21   :  { %193 = vmatprep.subr.mxu0 %v279_v0  ;;  %p250_p10 = scmp.ne.s32.totalorder %s173_s25, %s249_s26  ;;  %p255_p12 = scmp.lt.s32.totalorder %s249_s26, %s249_s26 }
  0x22   :  { %194 = vmatpush3.msra.mxu0 %v81_v4  ;;  %v55_v11 = vadd.f32 %v54_v7, %v53_v6  ;;  %v62_v12 = vadd.f32 %v61_v10, %v60_v8 }
  0x23   :  { %195 = vmatprep.subr.mxu0 %v279_v0  ;;  %p256_p13 = por %p255_p12, %p254_p11 }
  0x24   :  { %196 = vmatpush3.msra.mxu0 %v80_v9  ;;  %v56_v13 = vrot.slane %v55_v11, 2  ;;  %v63_v14 = vrot.slane %v62_v12, 2  ;;  %v49_v20 = vld [vmem:[#allocation2] sm:$0x3] }
  0x25   :  { %p257_p0 = pnand %p256_p13, %p250_p10 }
  0x26   :  { %v57_v15 = vadd.f32 %v56_v13, %v55_v11  ;;  %v64_v16 = vadd.f32 %v63_v14, %v62_v12 }
  0x28   :  { %v58_v17 = vrot.slane %v57_v15, 1  ;;  %v65_v18 = vrot.slane %v64_v16, 1 }
  0x2a   :  { %v59_v19 = vadd.f32 %v58_v17, %v57_v15  ;;  %v66_v21 = vadd.f32 %v65_v18, %v64_v16 }
  0x2c   :  { %v70_v22 = vsel %vm69_vm3, %v66_v21, %v59_v19 }
  0x2d   :  { %v72_v23 = vadd.f32 %v70_v22, %v49_v20 }
  0x2f   :  { %74 = vst.msk [vmem:[#allocation2] sm:$0x3] %vm47_vm0, %v72_v23 }
  0x36   :  { %v78_v24 = vld [vmem:[#allocation2] sm:$0x3] }
  0x37   :  { %v79_v25 = vmul.f32 0.125, %v78_v24 }
  0x39   :  { %198 = vmatmul.mubr.msk.f32.vlgmr.msra.gmra.mxu0 %vm52_vm2, %v79_v25 }
  0xf9   :  { %v160_v27 = vpop.f32.mrf.mxu0 }
  0xfa   :  { %v161_v28 = vadd.f32 %v182_v26, %v160_v27 }
  0xfb   :  { %v199_v29 = vpop.f32.mrf.mxu0 }
  0xfc   :  { %207 = vtanh.f32 %v161_v28 }
 0x109   :  { %v208_v30 = vpop.eup %207 }
 0x10a   :  { %165 = vst.msk [vmem:[#allocation8] sm:$0x3] %vm47_vm0, %v208_v30 }
 0x10b   :  { %260 = shalt.err (!%p257_p0)
}
 0x10c   :  { %175 = dma.vmem_to_hbm [thread:$0]  %s173_s25, 32, %s323_s3, [#allocation5]  }
 0x10d   :  { %273 = dma.done.wait [#allocation5], 32  }
 0x10e   :  { %274 = vsyncadd [#allocation5], 4294967264 }
 0x10f   :  { %179 = vsyncpa [#allocation4], 1 }
 0x110   :  { %180 = vsyncpa [#allocation7], 1 }
 0x111   :  { %181 = vsyncpa [#allocation5], 1 }

</bundles_post_ra>
